<compile_context>
chip_gen: v5e
topology: v5e:2x2
jax: 0.10.0
libtpu: 0.0.40
codegen_flags: <defaults>
</compile_context>

<pallas_src>
import functools

import jax
import jax.numpy as jnp
from jax.experimental import pallas as pl
from jax.experimental.pallas import tpu as pltpu


# ---------------------------------------------------------------------------
# Kernels
# ---------------------------------------------------------------------------

def _inorm_rows_kernel(x_ref, o_ref, *, eps, inv_n):
    """Path A: block = (TILE_ROWS, H*W); stats exact per block, two-pass."""
    xf = x_ref[...].astype(jnp.float32)
    mu = jnp.sum(xf, axis=-1, keepdims=True) * inv_n           # (R, 1)
    d = xf - mu                                                # (R, HW) f32
    var = jnp.sum(d * d, axis=-1, keepdims=True) * inv_n       # biased, >= 0
    scale = jax.lax.rsqrt(var + eps)
    # Normalized output is simply d * scale (d already needed for var).
    o_ref[...] = (d * scale).astype(o_ref.dtype)


def _inorm_split_kernel(x_ref, o_ref, s_ref, ss_ref, *, eps, inv_n, hw, hw_chunk):
    """Path B: H*W split into chunks.  grid = (row_tiles, 2, hw_tiles)."""
    p = pl.program_id(1)
    j = pl.program_id(2)

    @pl.when(jnp.logical_and(p == 0, j == 0))
    def _():
        s_ref[...] = jnp.zeros_like(s_ref)
        ss_ref[...] = jnp.zeros_like(ss_ref)

    @pl.when(p == 0)
    def _():
        xf = x_ref[...].astype(jnp.float32)
        if hw % hw_chunk != 0:
            # Mask out-of-bounds lanes of the partial last chunk so undefined
            # data never pollutes the statistics.
            col = jax.lax.broadcasted_iota(jnp.int32, xf.shape, 1) + j * hw_chunk
            xf = jnp.where(col < hw, xf, 0.0)
        s_ref[...] += jnp.sum(xf, axis=-1, keepdims=True)
        ss_ref[...] += jnp.sum(xf * xf, axis=-1, keepdims=True)

    @pl.when(p == 1)
    def _():
        mu = s_ref[...] * inv_n
        # TODO(synk): one-pass E[x^2]-mu^2 here (clamped); a fully
        # cancellation-safe two-pass over a split H*W would need a third
        # sweep of the input.
        var = jnp.maximum(ss_ref[...] * inv_n - mu * mu, 0.0)
        scale = jax.lax.rsqrt(var + eps)
        shift = -mu * scale
        x = x_ref[...]
        if x.dtype == jnp.float32:
            o_ref[...] = (x * scale + shift).astype(o_ref.dtype)
        else:
            # Narrow dtypes (bf16 etc.): normalize in the native dtype so the
            # full-size chunk never materializes as an f32 temporary.
            o_ref[...] = (x * scale.astype(x.dtype)
                          + shift.astype(x.dtype)).astype(o_ref.dtype)


# ---------------------------------------------------------------------------
# Tiling / budget heuristics
# ---------------------------------------------------------------------------

def _sublane(itemsize):
    # 8 rows for 32-bit, 16 for 16-bit, 32 for 8-bit dtypes.
    return max(8, 32 // max(int(itemsize), 1))


def _round_up(x, m):
    return ((x + m - 1) // m) * m


def _vmem_budget_bytes():
    """(working-set budget, scoped vmem_limit_bytes), generation-aware."""
    try:
        cap = int(pltpu.get_tpu_info().vmem_capacity_bytes)
    except Exception:
        cap = 64 * 1024 * 1024  # conservative (v7x-sized) fallback
    if cap >= 100 * 1024 * 1024:
        # v5e / v6e: 128 MiB physical VMEM -> bigger blocks, fewer steps.
        return 48 * 1024 * 1024, 96 * 1024 * 1024
    # v7x: 64 MiB physical per TensorCore -> stay well under.
    return 22 * 1024 * 1024, 32 * 1024 * 1024


def _plan(rows, hw, itemsize, budget_bytes):
    """Returns ('rows', tile_rows, None) or ('split', tile_rows, hw_chunk)."""
    sub = _sublane(itemsize)

    # Per-row per-step VMEM cost: double-buffered input + output blocks plus
    # ~2 full-size f32 temporaries (the upcast input and the centered diff).
    per_row_a = hw * (4 * itemsize + 8)
    max_rows = (budget_bytes // per_row_a) // sub * sub

    if max_rows >= sub:
        # ---- Path A: whole H*W per block ---------------------------------
        tile_rows = min(max_rows, _round_up(rows, sub))
        if tile_rows >= rows:
            tile_rows = rows  # block equal to the full dim is always legal
        # Prefer >= 2 grid steps (v7x dual-TC sharding + DMA/compute overlap)
        # but never over-split small problems into sub-roofline blocks.
        if rows > sub and pl.cdiv(rows, tile_rows) < 2:
            half = _round_up(pl.cdiv(rows, 2), sub)
            if half * hw * itemsize >= 512 * 1024:
                tile_rows = min(tile_rows, half)
        return "rows", tile_rows, None

    # ---- Path B: split H*W (minimum row tile, lane-aligned hw chunks) -----
    tile_rows = sub
    per_col_b = tile_rows * (4 * itemsize + 8)
    hw_chunk_max = max(128, (budget_bytes // per_col_b) // 128 * 128)
    n_chunks = pl.cdiv(hw, hw_chunk_max)
    hw_chunk = _round_up(pl.cdiv(hw, n_chunks), 128)      # balanced chunks
    hw_chunk = min(hw_chunk, _round_up(hw, 128))
    return "split", tile_rows, hw_chunk


# ---------------------------------------------------------------------------
# Wrapper
# ---------------------------------------------------------------------------

def my_instance_norm_2d(x, eps=1e-5, *, _vmem_budget_bytes_override=None):
    """Pallas TPU InstanceNorm2d forward (affine=False, no running stats).

    x: (B, C, H, W) -> normalized (B, C, H, W), same dtype as x.
    """
    assert x.ndim == 4
    b, c, h, w = x.shape
    rows, hw = b * c, h * w

    # Free reshape for contiguous NCHW: one row per (b, c) spatial slab.
    x2 = x.reshape(rows, hw)

    itemsize = jnp.dtype(x.dtype).itemsize
    budget, vmem_limit = _vmem_budget_bytes()
    if _vmem_budget_bytes_override is not None:   # testing hook for Path B
        budget = int(_vmem_budget_bytes_override)
    mode, tile_rows, hw_chunk = _plan(rows, hw, itemsize, budget)

    inv_n = 1.0 / float(hw)
    eps = float(eps)

    if mode == "rows":
        grid = (pl.cdiv(rows, tile_rows),)
        kernel = functools.partial(_inorm_rows_kernel, eps=eps, inv_n=inv_n)
        out2 = pl.pallas_call(
            kernel,
            out_shape=jax.ShapeDtypeStruct((rows, hw), x.dtype),
            grid_spec=pltpu.PrefetchScalarGridSpec(
                num_scalar_prefetch=0,
                grid=grid,
                in_specs=[pl.BlockSpec((tile_rows, hw), lambda i: (i, 0))],
                out_specs=pl.BlockSpec((tile_rows, hw), lambda i: (i, 0)),
            ),
            compiler_params=pltpu.CompilerParams(
                dimension_semantics=("parallel",),
                vmem_limit_bytes=vmem_limit,
            ),
            cost_estimate=pl.CostEstimate(
                flops=5 * rows * hw,
                transcendentals=rows,
                bytes_accessed=2 * rows * hw * itemsize,
            ),
        )(x2)
    else:
        hw_tiles = pl.cdiv(hw, hw_chunk)
        grid = (pl.cdiv(rows, tile_rows), 2, hw_tiles)
        kernel = functools.partial(
            _inorm_split_kernel, eps=eps, inv_n=inv_n, hw=hw, hw_chunk=hw_chunk
        )
        out2 = pl.pallas_call(
            kernel,
            out_shape=jax.ShapeDtypeStruct((rows, hw), x.dtype),
            grid_spec=pltpu.PrefetchScalarGridSpec(
                num_scalar_prefetch=0,
                grid=grid,
                in_specs=[
                    pl.BlockSpec((tile_rows, hw_chunk), lambda i, p, j: (i, j)),
                ],
                # During the stats phase (p == 0) the output block index is
                # pinned to (i, 0): nothing is flushed to HBM until phase 1
                # writes each chunk exactly once (2 reads + 1 write total).
                out_specs=pl.BlockSpec(
                    (tile_rows, hw_chunk), lambda i, p, j: (i, j * p)
                ),
                scratch_shapes=[
                    pltpu.VMEM((tile_rows, 1), jnp.float32),   # sum(x)
                    pltpu.VMEM((tile_rows, 1), jnp.float32),   # sum(x*x)
                ],
            ),
            compiler_params=pltpu.CompilerParams(
                dimension_semantics=("parallel", "arbitrary", "arbitrary"),
                vmem_limit_bytes=vmem_limit,
            ),
            cost_estimate=pl.CostEstimate(
                flops=7 * rows * hw,
                transcendentals=rows,
                bytes_accessed=3 * rows * hw * itemsize,
            ),
        )(x2)

    return out2.reshape(b, c, h, w)


def _reference_instance_norm(x, eps=1e-5):
    x32 = x.astype(jnp.float32)
    mu = jnp.mean(x32, axis=(2, 3), keepdims=True)
    var = jnp.var(x32, axis=(2, 3), keepdims=True)  # biased (ddof=0)
    return ((x32 - mu) / jnp.sqrt(var + eps)).astype(x.dtype)


# TODO(synk): track_running_stats=True (running mean/var + momentum buffer
# updates in train mode) and the optional AffineChannelwise scale/shift are
# not part of the default config and are not implemented in the kernel.

if __name__ == "__main__":
    key = jax.random.PRNGKey(0)
    k1, k2 = jax.random.split(key)

    # --- Test 1: Path A (whole-row blocks), the module's typical use -------
    B, C, H, W = 2, 4, 16, 16
    x = jax.random.normal(k1, (B, C, H, W), dtype=jnp.float32)
    out = jax.block_until_ready(my_instance_norm_2d(x))
    ref = _reference_instance_norm(x)
    assert out.shape == (B, C, H, W)
    assert jnp.allclose(out, ref, atol=1e-5, rtol=1e-5), (
        float(jnp.max(jnp.abs(out - ref)))
    )

    # --- Test 2: Path B (split H*W) exercised at a small shape by forcing a
    # tiny VMEM budget; also covers a non-128-multiple H*W (masked stats +
    # partial output blocks). ------------------------------------------------
    x2 = jax.random.normal(k2, (2, 4, 18, 18), dtype=jnp.float32)
    out2 = jax.block_until_ready(
        my_instance_norm_2d(x2, _vmem_budget_bytes_override=32 * 1024)
    )
    ref2 = _reference_instance_norm(x2)
    assert out2.shape == x2.shape
    assert jnp.allclose(out2, ref2, atol=1e-4, rtol=1e-4), (
        float(jnp.max(jnp.abs(out2 - ref2)))
    )

    print("KERNEL_OK")
</pallas_src>

<mosaic_0001>
module attributes {stable_mosaic.version = 11 : i64} {
  func.func @_inorm_rows_kernel(%arg0: i32, %arg1: memref<8x256xf32, #tpu.memory_space<vmem>>, %arg2: memref<8x256xf32, #tpu.memory_space<vmem>>) attributes {dimension_semantics = [#tpu.dimension_semantics<parallel>], iteration_bounds = array<i64: 1>, scalar_prefetch = 0 : i64, scratch_operands = 0 : i64, tpu.core_type = #tpu.core_type<tc>, window_params = [{transform_indices = @transform_0, window_bounds = array<i64: 8, 256>}, {transform_indices = @transform_1, window_bounds = array<i64: 8, 256>}]} {
    %c0 = arith.constant 0 : index
    %c0_0 = arith.constant 0 : index
    %0 = vector.load %arg1[%c0, %c0_0] : memref<8x256xf32, #tpu.memory_space<vmem>>, vector<8x256xf32>
    %cst = arith.constant dense<0.000000e+00> : vector<8xf32>
    %1 = vector.multi_reduction <add>, %0, %cst [1] : vector<8x256xf32> to vector<8xf32>
    %2 = vector.shape_cast %1 : vector<8xf32> to vector<8x1xf32>
    %cst_1 = arith.constant 3.906250e-03 : f32
    %3 = vector.broadcast %cst_1 : f32 to vector<8x1xf32>
    %4 = arith.mulf %2, %3 : vector<8x1xf32>
    %5 = vector.broadcast %4 : vector<8x1xf32> to vector<8x256xf32>
    %6 = arith.subf %0, %5 : vector<8x256xf32>
    %7 = arith.mulf %6, %6 : vector<8x256xf32>
    %cst_2 = arith.constant dense<0.000000e+00> : vector<8xf32>
    %8 = vector.multi_reduction <add>, %7, %cst_2 [1] : vector<8x256xf32> to vector<8xf32>
    %9 = vector.shape_cast %8 : vector<8xf32> to vector<8x1xf32>
    %cst_3 = arith.constant 3.906250e-03 : f32
    %10 = vector.broadcast %cst_3 : f32 to vector<8x1xf32>
    %11 = arith.mulf %9, %10 : vector<8x1xf32>
    %cst_4 = arith.constant 9.99999974E-6 : f32
    %12 = vector.broadcast %cst_4 : f32 to vector<8x1xf32>
    %13 = arith.addf %11, %12 : vector<8x1xf32>
    %14 = math.rsqrt %13 : vector<8x1xf32>
    %15 = vector.broadcast %14 : vector<8x1xf32> to vector<8x256xf32>
    %16 = arith.mulf %6, %15 : vector<8x256xf32>
    %c0_5 = arith.constant 0 : index
    %c0_6 = arith.constant 0 : index
    %17 = vector.load %arg2[%c0_5, %c0_6] : memref<8x256xf32, #tpu.memory_space<vmem>>, vector<8x256xf32>
    tpu.vector_store %arg2[%c0_5, %c0_6], %16 {strides = array<i32>} : memref<8x256xf32, #tpu.memory_space<vmem>>, vector<8x256xf32>,
    return
  }
  func.func @transform_0(%arg0: i32) -> (i32, i32) {
    %c0_i32 = arith.constant 0 : i32
    %c0_i32_0 = arith.constant 0 : i32
    return %arg0, %c0_i32 : i32, i32
  }
  func.func @transform_1(%arg0: i32) -> (i32, i32) {
    %c0_i32 = arith.constant 0 : i32
    %c0_i32_0 = arith.constant 0 : i32
    return %arg0, %c0_i32 : i32, i32
  }
}

</mosaic_0001>

<bundles_post_ra>
// kernel: tpu_custom_call.1
= control target key start
LH: loop header
LB: loop body
LE: loop exit
PB: predicated region body
PF: predicated region fallthrough
CT: control target
= control target key end

     0   :  { %6 = vsyncpa [#allocation3], 0  ;;  %s143_s0 = inlined_call_operand.hbm [shape: f32[8,256], index: 0, kind: input, shape index: {}]   ;;  %s144_s1 = inlined_call_operand.hbm [shape: f32[8,256], index: 1, kind: output, shape index: {}]  }
   0x1   :  { %7 = vsyncpa [#allocation4], 0  ;;  %s13_s8 = sshll.u32 %s143_s0, 4  ;;  %s125_s9 = smov [#allocation2]   ;;  %s14_s8 = int_to_ptr.hbm [resolvable:$true] %s13_s8 }
   0x2   :  { %s15_s10 = sshll.u32 %s125_s9, 4  ;;  %s16_s10 = int_to_ptr.vmem [resolvable:$true] %s15_s10 }
   0x3   :  { %18 = dma.hbm_to_vmem [thread:$0]  %s14_s8, 256, %s16_s10, [#allocation3]  }
   0x4   :  { %121 = dma.done.wait [#allocation3], 256  }
   0x5   :  { %122 = vsyncadd [#allocation3], 4294967040  ;;  %v23_v0 = vld [vmem:[#allocation2] sm:$0xff]  ;;  %v24_v1 = vld [vmem:[#allocation2 + $0x8] sm:$0xff]  ;;  %s126_s0 = smov [#allocation5]   ;;  %s59_s14 = sshll.u32 %s144_s1, 4  ;;  %s60_s14 = int_to_ptr.hbm [resolvable:$true] %s59_s14 }
   0x6   :  { %v25_v2 = vadd.f32 %v24_v1, %v23_v0  ;;  %s57_s11 = sshll.u32 %s126_s0, 4  ;;  %s58_s11 = int_to_ptr.vmem [resolvable:$true] %s57_s11 }
   0x8   :  { %26 = vadd.xlane.f32.xlu0 %v25_v2 }
  0x7b   :  { %v27_v3 = vpop.xlane.xlu0 %26 }
  0x7c   :  { %v28_v4 = vmul.f32 0.00390625, %v27_v3 }
  0x7e   :  { %v29_v5 = vsub.f32 %v23_v0, %v28_v4  ;;  %v30_v6 = vsub.f32 %v24_v1, %v28_v4 }
  0x80   :  { %v31_v7 = vmul.f32 %v29_v5, %v29_v5  ;;  %v32_v8 = vmul.f32 %v30_v6, %v30_v6 }
  0x82   :  { %v33_v9 = vadd.f32 %v32_v8, %v31_v7 }
  0x84   :  { %34 = vadd.xlane.f32.xlu0 %v33_v9 }
  0xf7   :  { %v35_v10 = vpop.xlane.xlu0 %34 }
  0xf8   :  { %v36_v11 = vmul.f32 0.00390625, %v35_v10 }
  0xfa   :  { %v37_v12 = vadd.f32 1e-05, %v36_v11 }
  0xfc   :  { %71 = vrsqrt.f32 %v37_v12  ;;  %vm44_vm1 = vweird.f32 %v37_v12 }
 0x102   :  { %v72_v13 = vpop.eup %71 }
 0x103   :  { %v39_v14 = vmul.f32 %v72_v13, %v37_v12  ;;  %vm45_vm0 = vweird.f32 %v72_v13 }
 0x104   :  { %vm46_vm2 = vmor %vm44_vm1, %vm45_vm0 }
 0x105   :  { %v40_v15 = vmul.f32 %v72_v13, %v39_v14 }
 0x107   :  { %v41_v16 = vmul.f32 0.5, %v40_v15 }
 0x109   :  { %v42_v17 = vsub.f32 1.5, %v41_v16 }
 0x10b   :  { %v43_v18 = vmul.f32 %v72_v13, %v42_v17 }
 0x10d   :  { %v47_v19 = vsel %vm46_vm2, %v72_v13, %v43_v18 }
 0x10e   :  { %v48_v20 = vmul.f32 %v47_v19, %v29_v5  ;;  %v49_v21 = vmul.f32 %v47_v19, %v30_v6 }
 0x110   :  { %50 = vst [vmem:[#allocation5] sm:$0xff] %v48_v20 }
 0x111   :  { %51 = vst [vmem:[#allocation5 + $0x8] sm:$0xff] %v49_v21 }
 0x112   :  { %62 = dma.vmem_to_hbm [thread:$0]  %s58_s11, 256, %s60_s14, [#allocation4]  }
 0x113   :  { %123 = dma.done.wait [#allocation4], 256  }
 0x114   :  { %124 = vsyncadd [#allocation4], 4294967040 }
 0x115   :  { %67 = vsyncpa [#allocation3], 1 }
 0x116   :  { %68 = vsyncpa [#allocation4], 1 }

</bundles_post_ra>
